<compile_context>
chip_gen: v6e
topology: v6e:2x2x1
jax: 0.10.0
libtpu: 0.0.40
codegen_flags: <defaults>
</compile_context>

<pallas_src>
import numpy as np
import jax
import jax.numpy as jnp
from jax.experimental import pallas as pl
from jax.experimental.pallas import tpu as pltpu

_LANE = 128
_TARGET_TILE_BYTES = 2 * 1024 * 1024  # ~2 MiB per tile per direction (fits 32 MiB scoped VMEM w/ double buffering on v5e/v6e/v7x)


def _identity_copy_kernel(x_ref, o_ref):
    # Straight VMEM tile copy; blocks are contiguous HBM chunks.
    o_ref[...] = x_ref[...]


def _sublane_pack(dtype) -> int:
    """Sublanes per packed vreg tile: 8 for fp32, 16 for bf16, 32 for int8/fp8."""
    itemsize = jnp.dtype(dtype).itemsize
    return max(8, 8 * (4 // max(itemsize, 1)))


def identity_first_stage(x: jax.Array) -> jax.Array:
    """Pallas implementation of IdentityFirstStage.forward (pure identity)."""
    orig_shape = x.shape
    orig_dtype = x.dtype
    total = int(np.prod(orig_shape)) if orig_shape else 1
    if total == 0:
        return x  # nothing to copy

    itemsize = jnp.dtype(orig_dtype).itemsize
    pack = _sublane_pack(orig_dtype)

    # Large, dtype-packed tile: ~2 MiB worth of (tile_rows, 128) elements,
    # tile_rows a multiple of the packed sublane count.
    target_rows = max(pack, (_TARGET_TILE_BYTES // (_LANE * itemsize)) // pack * pack)

    rows_needed = pl.cdiv(total, _LANE)
    tile_rows = min(target_rows, pl.cdiv(rows_needed, pack) * pack)
    grid_m = pl.cdiv(rows_needed, tile_rows)
    rows = grid_m * tile_rows            # rows is a multiple of tile_rows -> no ragged block
    padded_total = rows * _LANE

    x_flat = x.reshape(-1)
    if padded_total != total:
        x_flat = jnp.pad(x_flat, (0, padded_total - total))
    x2d = x_flat.reshape(rows, _LANE)    # each (tile_rows, 128) block is contiguous in HBM

    out2d = pl.pallas_call(
        _identity_copy_kernel,
        out_shape=jax.ShapeDtypeStruct((rows, _LANE), orig_dtype),
        grid=(grid_m,),
        in_specs=[pl.BlockSpec((tile_rows, _LANE), lambda i: (i, 0))],
        out_specs=pl.BlockSpec((tile_rows, _LANE), lambda i: (i, 0)),
        input_output_aliases={0: 0},     # output aliases the (possibly reshaped) input buffer
        compiler_params=pltpu.CompilerParams(
            dimension_semantics=("parallel",),  # shard grid across TensorCores (v7x megacore)
        ),
    )(x2d)

    out_flat = out2d.reshape(-1)
    if padded_total != total:
        out_flat = out_flat[:total]
    return out_flat.reshape(orig_shape)


def encode(x, *args, **kwargs):
    return identity_first_stage(x)


def decode(x, *args, **kwargs):
    return identity_first_stage(x)


def quantize(x, *args, vq_interface: bool = False, **kwargs):
    y = identity_first_stage(x)
    if vq_interface:
        return (y, None, [None, None, None])
    return y


if __name__ == "__main__":
    key = jax.random.PRNGKey(0)

    # Main path: NCHW first-stage style input (divides cleanly into 128 lanes).
    x = jax.random.normal(key, (2, 4, 16, 16), dtype=jnp.float32)
    y = jax.block_until_ready(identity_first_stage(x))
    assert y.shape == x.shape and y.dtype == x.dtype
    assert bool(jnp.array_equal(y, x))

    # Irregular size (padding path) + sub-32-bit dtype (packed sublane path).
    x_odd = jax.random.normal(jax.random.PRNGKey(1), (3, 5, 7), dtype=jnp.bfloat16)
    y_odd = jax.block_until_ready(identity_first_stage(x_odd))
    assert y_odd.shape == x_odd.shape and y_odd.dtype == x_odd.dtype
    assert bool(jnp.array_equal(y_odd, x_odd))

    # vq_interface path (pure Python tuple wrapping, no extra compute).
    q, _, aux = quantize(x, vq_interface=True)
    jax.block_until_ready(q)
    assert bool(jnp.array_equal(q, x)) and aux == [None, None, None]

    print("KERNEL_OK")
</pallas_src>

<mosaic_0001>
module attributes {stable_mosaic.version = 11 : i64} {
  func.func @_identity_copy_kernel(%arg0: i32, %arg1: memref<16x128xf32, #tpu.memory_space<vmem>>, %arg2: memref<16x128xf32, #tpu.memory_space<vmem>>) attributes {dimension_semantics = [#tpu.dimension_semantics<parallel>], iteration_bounds = array<i64: 1>, scalar_prefetch = 0 : i64, scratch_operands = 0 : i64, tpu.core_type = #tpu.core_type<tc>, window_params = [{transform_indices = @transform_0, window_bounds = array<i64: 16, 128>}, {transform_indices = @transform_1, window_bounds = array<i64: 16, 128>}]} {
    %c0 = arith.constant 0 : index
    %c0_0 = arith.constant 0 : index
    %0 = vector.load %arg1[%c0, %c0_0] : memref<16x128xf32, #tpu.memory_space<vmem>>, vector<16x128xf32>
    %c0_1 = arith.constant 0 : index
    %c0_2 = arith.constant 0 : index
    %1 = vector.load %arg2[%c0_1, %c0_2] : memref<16x128xf32, #tpu.memory_space<vmem>>, vector<16x128xf32>
    tpu.vector_store %arg2[%c0_1, %c0_2], %0 {strides = array<i32>} : memref<16x128xf32, #tpu.memory_space<vmem>>, vector<16x128xf32>,
    return
  }
  func.func @transform_0(%arg0: i32) -> (i32, i32) {
    %c0_i32 = arith.constant 0 : i32
    %c0_i32_0 = arith.constant 0 : i32
    return %arg0, %c0_i32 : i32, i32
  }
  func.func @transform_1(%arg0: i32) -> (i32, i32) {
    %c0_i32 = arith.constant 0 : i32
    %c0_i32_0 = arith.constant 0 : i32
    return %arg0, %c0_i32 : i32, i32
  }
}

</mosaic_0001>

<bundles_post_ra>
// kernel: tpu_custom_call.1
= control target key start
LH: loop header
LB: loop body
LE: loop exit
PB: predicated region body
PF: predicated region fallthrough
CT: control target
= control target key end

     0   :  { %6 = vsyncpa [#allocation3], 0  ;;  %s112_s0 = inlined_call_operand.hbm [shape: f32[16,128], index: 0, kind: input, shape index: {}, may-alias: {0,1}]   ;;  %s113_s1 = inlined_call_operand.hbm [shape: f32[16,128], index: 1, kind: output, shape index: {}, may-alias: {0,1}]  }
   0x1   :  { %7 = vsyncpa [#allocation4], 0  ;;  %s92_s6 = smov [#allocation2]  }
   0x2   :  { %s13_s7 = sshll.u32 %s92_s6, 4  ;;  %s14_s7 = int_to_ptr.vmem [resolvable:$true] %s13_s7 }
   0x3   :  { %s56_s8 = scalar_lea.vmem %s14_s7, 256  ;;  %p61_p1 = scmp.lt.s32.totalorder %s14_s7, %s14_s7 }
   0x4   :  { %p57_p0 = scmp.ne.s32.totalorder %s14_s7, %s56_s8  ;;  %p62_p2 = scmp.lt.s32.totalorder %s56_s8, %s56_s8 }
   0x6   :  { %p63_p3 = por %p62_p2, %p61_p1 }
   0x8   :  { %p64_p4 = pnand %p63_p3, %p57_p0 }
   0xa   :  { %67 = shalt.err (!%p64_p4)
}
   0xb   :  { %s93_s9 = smov 128   ;;  %s94_s10 = smov 8  }
   0xc   :  { %19 = dma.hbm_to_vmem [thread:$0]  %s112_s0, 256, %s14_s7, [#allocation3], %s93_s9, %s93_s9, %s94_s10  }
   0xd   :  { %88 = dma.done.wait [#allocation3], 256  }
   0xe   :  { %89 = vsyncadd [#allocation3], 4294967040  ;;  %s95_s13 = smov [#allocation5]   ;;  %v23_v0 = vld [vmem:[#allocation2] sm:$0xff]  ;;  %v24_v1 = vld [vmem:[#allocation2 + $0x8] sm:$0xff] }
   0xf   :  { %s32_s14 = sshll.u32 %s95_s13, 4  ;;  %25 = vst [vmem:[#allocation5] sm:$0xff] %v23_v0  ;;  %26 = vst [vmem:[#allocation5 + $0x8] sm:$0xff] %v24_v1  ;;  %s33_s14 = int_to_ptr.vmem [resolvable:$true] %s32_s14 }
  0x10   :  { %s68_s15 = scalar_lea.vmem %s33_s14, 256  ;;  %p73_p6 = scmp.lt.s32.totalorder %s33_s14, %s33_s14 }
  0x11   :  { %p69_p5 = scmp.ne.s32.totalorder %s33_s14, %s68_s15  ;;  %p74_p7 = scmp.lt.s32.totalorder %s68_s15, %s68_s15 }
  0x13   :  { %p75_p8 = por %p74_p7, %p73_p6 }
  0x15   :  { %p76_p9 = pnand %p75_p8, %p69_p5 }
  0x17   :  { %79 = shalt.err (!%p76_p9)
}
  0x18   :  { %38 = dma.vmem_to_hbm [thread:$0]  %s33_s14, 256, %s113_s1, [#allocation4], %s93_s9, %s93_s9, %s94_s10  }
  0x19   :  { %90 = dma.done.wait [#allocation4], 256  }
  0x1a   :  { %91 = vsyncadd [#allocation4], 4294967040 }
  0x1b   :  { %42 = vsyncpa [#allocation3], 1 }
  0x1c   :  { %43 = vsyncpa [#allocation4], 1 }

</bundles_post_ra>
